<compile_context>
chip_gen: v6e
topology: v6e:2x2x1
jax: 0.10.0
libtpu: 0.0.40
codegen_flags: <defaults>
</compile_context>

<pallas_src>
import jax
import jax.numpy as jnp
from jax.experimental import pallas as pl
from jax.experimental.pallas import tpu as pltpu


def dgi_loss_kernel(pos_ref, neg_ref, wt_ref, b_ref, out_ref):
    """One batch tile of DGI samples.

    pos_ref: (BT, Np, D) VMEM    neg_ref: (BT, Nn, D) VMEM
    wt_ref:  (D, D) VMEM  (== Bilinear weight A[0] transposed)
    b_ref:   (1, 1) SMEM  (Bilinear bias scalar)
    out_ref: (BT, 1) VMEM  per-sample BCE-with-logits losses.
    """
    pos = pos_ref[...].astype(jnp.float32)     # (BT, Np, D)
    neg = neg_ref[...].astype(jnp.float32)     # (BT, Nn, D)
    wt = wt_ref[...].astype(jnp.float32)       # (D, D) = W^T
    bias = b_ref[0, 0]                         # scalar from SMEM

    n_pos = pos.shape[1]
    n_neg = neg.shape[1]

    # Summary vectors for all samples: s = sigmoid(mean(pos, axis=1)) -> (BT, D)
    inv_np = jnp.float32(1.0 / n_pos)
    s = jax.nn.sigmoid(jnp.sum(pos, axis=1) * inv_np)

    # Bilinear(x, s) = x @ W @ s + b.  With W^T pre-transposed:
    #   u[b, i] = sum_j W[i, j] * s[b, j]  ==  (s @ W^T)[b, i]
    u = jnp.dot(s, wt, preferred_element_type=jnp.float32)       # (BT, D) on MXU

    # Logits: row-wise dot of each node embedding with its sample's u vector.
    # (VPU multiply + XLU lane-reduce; Np/Nn are small so MXU gives no benefit.)
    d1 = jnp.sum(pos * u[:, None, :], axis=-1) + bias            # (BT, Np) label 1
    d2 = jnp.sum(neg * u[:, None, :], axis=-1) + bias            # (BT, Nn) label 0

    # BCEWithLogitsLoss (mean reduction), numerically stable:
    #   label=1 -> softplus(-logit), label=0 -> softplus(logit)   (EUP exp/log)
    def softplus(x):
        return jnp.maximum(x, 0.0) + jnp.log1p(jnp.exp(-jnp.abs(x)))

    total = (jnp.sum(softplus(-d1), axis=-1, keepdims=True)
             + jnp.sum(softplus(d2), axis=-1, keepdims=True))    # (BT, 1)
    inv_n = jnp.float32(1.0 / (n_pos + n_neg))
    out_ref[...] = total * inv_n


def dgi_losses(pos_all, neg_all, W, bias, *, tile_b=None):
    """pos_all, neg_all: (B, N, D) gathered embeddings. Returns (B,) losses."""
    B, Np, D = pos_all.shape
    _, Nn, _ = neg_all.shape

    # One grid step covers tile_b samples; default = whole batch in one step.
    if tile_b is None or tile_b <= 0 or B % tile_b != 0:
        tile_b = B

    wt = jnp.asarray(W, jnp.float32).T                     # pre-transpose once
    bias2d = jnp.reshape(jnp.asarray(bias, jnp.float32), (1, 1))

    out = pl.pallas_call(
        dgi_loss_kernel,
        out_shape=jax.ShapeDtypeStruct((B, 1), jnp.float32),
        grid_spec=pltpu.PrefetchScalarGridSpec(
            num_scalar_prefetch=0,
            grid=(B // tile_b,),
            in_specs=[
                pl.BlockSpec((tile_b, Np, D), lambda b: (b, 0, 0)),   # pos tile
                pl.BlockSpec((tile_b, Nn, D), lambda b: (b, 0, 0)),   # neg tile
                pl.BlockSpec((D, D), lambda b: (0, 0)),               # W^T (resident)
                pl.BlockSpec(memory_space=pltpu.MemorySpace.SMEM),    # bias scalar
            ],
            # Per-tile output block -> batch axis is independent (megacore-able).
            out_specs=pl.BlockSpec((tile_b, 1), lambda b: (b, 0)),
        ),
        compiler_params=pltpu.CompilerParams(
            dimension_semantics=("parallel",)),
    )(pos_all, neg_all, wt, bias2d)
    return out[:, 0]


def reference_losses(pos_all, neg_all, W, bias):
    """Plain-JAX mirror of DGI_trainer.get_loss for verification."""
    def one(pos, neg):
        s = jax.nn.sigmoid(jnp.mean(pos, axis=0))                    # (D,)
        d1 = pos @ W @ s + bias[0]                                   # (Np,)
        d2 = neg @ W @ s + bias[0]                                   # (Nn,)
        y = jnp.concatenate([d1, d2], axis=0)
        label = jnp.concatenate(
            [jnp.ones_like(d1), jnp.zeros_like(d2)], axis=0)
        per = jnp.maximum(y, 0.0) - y * label + jnp.log1p(jnp.exp(-jnp.abs(y)))
        return jnp.mean(per)
    return jax.vmap(one)(pos_all, neg_all)


if __name__ == "__main__":
    # Small, deterministic synthetic setup consistent with the module:
    # nemb embedding dim, batch_size samples per forward call, each sample a
    # fixed-size set of positive / negative (corrupted) node embeddings.
    nemb = 128
    batch_size = 4
    Np, Nn = 16, 16
    num_nodes = 64

    key = jax.random.PRNGKey(0)
    k_emb, k_w, k_b, k_pos, k_neg = jax.random.split(key, 5)

    # "homo_emb" = concatenated per-ntype embeddings (glue done in plain JAX).
    homo_emb = jax.random.normal(k_emb, (num_nodes, nemb), dtype=jnp.float32)

    # nn.Bilinear(nemb, nemb, 1) params, PyTorch default init U(-1/sqrt(in1), +).
    bound = 1.0 / (nemb ** 0.5)
    W = jax.random.uniform(k_w, (nemb, nemb), jnp.float32, -bound, bound)
    bias = jax.random.uniform(k_b, (1,), jnp.float32, -bound, bound)

    # TODO(synk): DGL NeighborSampler-based presample() has no Pallas/JAX
    # equivalent; synthetic fixed-size index sets stand in for (pos_id, neg_id).
    pos_id = jax.random.randint(k_pos, (batch_size, Np), 0, num_nodes)
    neg_id = jax.random.randint(k_neg, (batch_size, Nn), 0, num_nodes)
    pos_all = homo_emb[pos_id]   # (B, Np, nemb) gather = glue, stays in JAX
    neg_all = homo_emb[neg_id]   # (B, Nn, nemb)

    losses = dgi_losses(pos_all, neg_all, W, bias)
    jax.block_until_ready(losses)

    ref = reference_losses(pos_all, neg_all, W, bias)
    assert losses.shape == (batch_size,)
    assert jnp.allclose(losses, ref, rtol=1e-5, atol=1e-5), (losses, ref)

    print("KERNEL_OK")
</pallas_src>

<mosaic_0001>
module attributes {stable_mosaic.version = 11 : i64} {
  func.func @dgi_loss_kernel(%arg0: i32, %arg1: memref<4x16x128xf32, #tpu.memory_space<vmem>>, %arg2: memref<4x16x128xf32, #tpu.memory_space<vmem>>, %arg3: memref<128x128xf32, #tpu.memory_space<vmem>>, %arg4: memref<1x1xf32, #tpu.memory_space<smem>>, %arg5: memref<4x1xf32, #tpu.memory_space<vmem>>) attributes {dimension_semantics = [#tpu.dimension_semantics<parallel>], iteration_bounds = array<i64: 1>, scalar_prefetch = 0 : i64, scratch_operands = 0 : i64, tpu.core_type = #tpu.core_type<tc>, window_params = [{transform_indices = @transform_0, window_bounds = array<i64: 4, 16, 128>}, {transform_indices = @transform_1, window_bounds = array<i64: 4, 16, 128>}, {pipeline_mode = #tpu.pipeline_mode<synchronous>, transform_indices = @transform_2, window_bounds = array<i64: 128, 128>}, {transform_indices = @transform_3, window_bounds = array<i64: 1, 1>}, {transform_indices = @transform_4, window_bounds = array<i64: 4, 1>}]} {
    %c0 = arith.constant 0 : index
    %c0_0 = arith.constant 0 : index
    %c0_1 = arith.constant 0 : index
    %0 = vector.load %arg1[%c0, %c0_0, %c0_1] : memref<4x16x128xf32, #tpu.memory_space<vmem>>, vector<4x16x128xf32>
    %c0_2 = arith.constant 0 : index
    %c0_3 = arith.constant 0 : index
    %c0_4 = arith.constant 0 : index
    %1 = vector.load %arg2[%c0_2, %c0_3, %c0_4] : memref<4x16x128xf32, #tpu.memory_space<vmem>>, vector<4x16x128xf32>
    %c0_5 = arith.constant 0 : index
    %c0_6 = arith.constant 0 : index
    %2 = vector.load %arg3[%c0_5, %c0_6] : memref<128x128xf32, #tpu.memory_space<vmem>>, vector<128x128xf32>
    %c0_7 = arith.constant 0 : index
    %c0_8 = arith.constant 0 : index
    %3 = memref.load %arg4[%c0_7, %c0_8] : memref<1x1xf32, #tpu.memory_space<smem>>
    %cst = arith.constant dense<0.000000e+00> : vector<4x128xf32>
    %4 = vector.multi_reduction <add>, %0, %cst [1] : vector<4x16x128xf32> to vector<4x128xf32>
    %cst_9 = arith.constant 6.250000e-02 : f32
    %5 = vector.broadcast %cst_9 : f32 to vector<4x128xf32>
    %6 = arith.mulf %4, %5 : vector<4x128xf32>
    %7 = arith.negf %6 : vector<4x128xf32>
    %8 = math.exp %7 : vector<4x128xf32>
    %cst_10 = arith.constant 1.000000e+00 : f32
    %9 = vector.broadcast %cst_10 : f32 to vector<4x128xf32>
    %10 = arith.addf %9, %8 : vector<4x128xf32>
    %11 = arith.divf %9, %10 : vector<4x128xf32>
    %cst_11 = arith.constant dense<0.000000e+00> : vector<4x128xf32>
    %12 = tpu.matmul %11, %2, %cst_11 {dimension_numbers = #tpu.dot_dimension_numbers<[1], [0], [0], [1], [0, 0, 1, 1], [], []>} : vector<4x128xf32>, vector<128x128xf32>, vector<4x128xf32> -> vector<4x128xf32>
    %13 = vector.shape_cast %12 : vector<4x128xf32> to vector<4x1x128xf32>
    %14 = vector.broadcast %13 : vector<4x1x128xf32> to vector<4x16x128xf32>
    %15 = arith.mulf %0, %14 : vector<4x16x128xf32>
    %cst_12 = arith.constant dense<0.000000e+00> : vector<4x16xf32>
    %16 = vector.multi_reduction <add>, %15, %cst_12 [2] : vector<4x16x128xf32> to vector<4x16xf32>
    %17 = vector.broadcast %3 : f32 to vector<4x16xf32>
    %18 = arith.addf %16, %17 : vector<4x16xf32>
    %19 = vector.shape_cast %12 : vector<4x128xf32> to vector<4x1x128xf32>
    %20 = vector.broadcast %19 : vector<4x1x128xf32> to vector<4x16x128xf32>
    %21 = arith.mulf %1, %20 : vector<4x16x128xf32>
    %cst_13 = arith.constant dense<0.000000e+00> : vector<4x16xf32>
    %22 = vector.multi_reduction <add>, %21, %cst_13 [2] : vector<4x16x128xf32> to vector<4x16xf32>
    %23 = vector.broadcast %3 : f32 to vector<4x16xf32>
    %24 = arith.addf %22, %23 : vector<4x16xf32>
    %cst_14 = arith.constant 0.000000e+00 : f32
    %25 = vector.broadcast %cst_14 : f32 to vector<4x16xf32>
    %26 = arith.subf %25, %18 : vector<4x16xf32>
    %cst_15 = arith.constant 0.000000e+00 : f32
    %27 = vector.broadcast %cst_15 : f32 to vector<4x16xf32>
    %28 = arith.maximumf %26, %27 : vector<4x16xf32>
    %29 = math.absf %26 : vector<4x16xf32>
    %cst_16 = arith.constant 0.000000e+00 : f32
    %30 = vector.broadcast %cst_16 : f32 to vector<4x16xf32>
    %31 = arith.subf %30, %29 : vector<4x16xf32>
    %32 = math.exp %31 : vector<4x16xf32>
    %33 = math.log1p %32 : vector<4x16xf32>
    %34 = arith.addf %28, %33 : vector<4x16xf32>
    %cst_17 = arith.constant dense<0.000000e+00> : vector<4xf32>
    %35 = vector.multi_reduction <add>, %34, %cst_17 [1] : vector<4x16xf32> to vector<4xf32>
    %36 = vector.shape_cast %35 : vector<4xf32> to vector<4x1xf32>
    %cst_18 = arith.constant 0.000000e+00 : f32
    %37 = vector.broadcast %cst_18 : f32 to vector<4x16xf32>
    %38 = arith.maximumf %24, %37 : vector<4x16xf32>
    %39 = math.absf %24 : vector<4x16xf32>
    %cst_19 = arith.constant 0.000000e+00 : f32
    %40 = vector.broadcast %cst_19 : f32 to vector<4x16xf32>
    %41 = arith.subf %40, %39 : vector<4x16xf32>
    %42 = math.exp %41 : vector<4x16xf32>
    %43 = math.log1p %42 : vector<4x16xf32>
    %44 = arith.addf %38, %43 : vector<4x16xf32>
    %cst_20 = arith.constant dense<0.000000e+00> : vector<4xf32>
    %45 = vector.multi_reduction <add>, %44, %cst_20 [1] : vector<4x16xf32> to vector<4xf32>
    %46 = vector.shape_cast %45 : vector<4xf32> to vector<4x1xf32>
    %47 = arith.addf %36, %46 : vector<4x1xf32>
    %cst_21 = arith.constant 3.125000e-02 : f32
    %48 = vector.broadcast %cst_21 : f32 to vector<4x1xf32>
    %49 = arith.mulf %47, %48 : vector<4x1xf32>
    %c0_22 = arith.constant 0 : index
    %c0_23 = arith.constant 0 : index
    %50 = vector.load %arg5[%c0_22, %c0_23] : memref<4x1xf32, #tpu.memory_space<vmem>>, vector<4x1xf32>
    tpu.vector_store %arg5[%c0_22, %c0_23], %49 {strides = array<i32>} : memref<4x1xf32, #tpu.memory_space<vmem>>, vector<4x1xf32>,
    return
  }
  func.func @transform_0(%arg0: i32) -> (i32, i32, i32) {
    %c0_i32 = arith.constant 0 : i32
    %c0_i32_0 = arith.constant 0 : i32
    %c0_i32_1 = arith.constant 0 : i32
    return %arg0, %c0_i32, %c0_i32_0 : i32, i32, i32
  }
  func.func @transform_1(%arg0: i32) -> (i32, i32, i32) {
    %c0_i32 = arith.constant 0 : i32
    %c0_i32_0 = arith.constant 0 : i32
    %c0_i32_1 = arith.constant 0 : i32
    return %arg0, %c0_i32, %c0_i32_0 : i32, i32, i32
  }
  func.func @transform_2(%arg0: i32) -> (i32, i32) {
    %c0_i32 = arith.constant 0 : i32
    %c0_i32_0 = arith.constant 0 : i32
    %c0_i32_1 = arith.constant 0 : i32
    return %c0_i32, %c0_i32_0 : i32, i32
  }
  func.func @transform_3(%arg0: i32) -> (i32, i32) {
    %c0_i32 = arith.constant 0 : i32
    %c0_i32_0 = arith.constant 0 : i32
    %c0_i32_1 = arith.constant 0 : i32
    return %c0_i32, %c0_i32_0 : i32, i32
  }
  func.func @transform_4(%arg0: i32) -> (i32, i32) {
    %c0_i32 = arith.constant 0 : i32
    %c0_i32_0 = arith.constant 0 : i32
    return %arg0, %c0_i32 : i32, i32
  }
}

</mosaic_0001>

<bundles_post_ra>
// kernel: tpu_custom_call.1
= control target key start
LH: loop header
LB: loop body
LE: loop exit
PB: predicated region body
PF: predicated region fallthrough
CT: control target
= control target key end

     0   :  { %10 = vsyncpa [#allocation4], 0  ;;  %s1287_s0 = inlined_call_operand.hbm [shape: f32[4,16,128], index: 0, kind: input, shape index: {}]   ;;  %s1288_s1 = inlined_call_operand.hbm [shape: f32[4,16,128], index: 1, kind: input, shape index: {}]   ;;  %s1289_s2 = inlined_call_operand.hbm [shape: f32[128,128], index: 2, kind: input, shape index: {}]   ;;  %s1290_s3 = inlined_call_operand.<no memory space> [shape: f32[1,1], index: 3, kind: input, shape index: {}]   ;;  %s1291_s4 = inlined_call_operand.vmem [shape: f32[4,1], index: 4, kind: output, shape index: {}]  }
   0x1   :  { %11 = vsyncpa [#allocation6], 0  ;;  %s912_s15 = smov [#allocation5]   ;;  %s913_s17 = smov [#allocation3]  }
   0x2   :  { %s29_s16 = sshll.u32 %s912_s15, 4  ;;  %s17_s18 = sshll.u32 %s913_s17, 4  ;;  %s30_s16 = int_to_ptr.vmem [resolvable:$true] %s29_s16  ;;  %s18_s18 = int_to_ptr.vmem [resolvable:$true] %s17_s18 }
   0x3   :  { %s856_s19 = scalar_lea.vmem %s30_s16, 1024  ;;  %p861_p1 = scmp.lt.s32.totalorder %s30_s16, %s30_s16 }
   0x4   :  { %p857_p0 = scmp.ne.s32.totalorder %s30_s16, %s856_s19  ;;  %p862_p2 = scmp.lt.s32.totalorder %s856_s19, %s856_s19 }
   0x6   :  { %p863_p3 = por %p862_p2, %p861_p1 }
   0x8   :  { %p864_p4 = pnand %p863_p3, %p857_p0 }
   0xa   :  { %867 = shalt.err (!%p864_p4)
}
   0xb   :  { %s914_s20 = smov 128   ;;  %s915_s21 = smov 8  }
   0xc   :  { %35 = dma.hbm_to_vmem [thread:$0]  %s1288_s1, 1024, %s30_s16, [#allocation6], %s914_s20, %s914_s20, %s915_s21  }
   0xd   :  { %s876_s24 = scalar_lea.vmem %s18_s18, 1024  ;;  %p881_p6 = scmp.lt.s32.totalorder %s18_s18, %s18_s18 }
   0xe   :  { %p877_p5 = scmp.ne.s32.totalorder %s18_s18, %s876_s24  ;;  %p882_p7 = scmp.lt.s32.totalorder %s876_s24, %s876_s24 }
  0x10   :  { %p883_p8 = por %p882_p7, %p881_p6 }
  0x12   :  { %p884_p9 = pnand %p883_p8, %p877_p5 }
  0x14   :  { %887 = shalt.err (!%p884_p9)
}
  0x15   :  { %23 = dma.hbm_to_vmem [thread:$0]  %s1287_s0, 1024, %s18_s18, [#allocation4], %s914_s20, %s914_s20, %s915_s21  }
  0x16   :  { %s916_s27 = smov [#allocation7]  }
  0x17   :  { %s41_s28 = sshll.u32 %s916_s27, 4  ;;  %s42_s28 = int_to_ptr.vmem [resolvable:$true] %s41_s28 }
  0x18   :  { %s896_s29 = scalar_lea.vmem %s42_s28, 2048  ;;  %p901_p11 = scmp.lt.s32.totalorder %s42_s28, %s42_s28 }
  0x19   :  { %p897_p10 = scmp.ne.s32.totalorder %s42_s28, %s896_s29  ;;  %p902_p12 = scmp.lt.s32.totalorder %s896_s29, %s896_s29 }
  0x1b   :  { %p903_p13 = por %p902_p12, %p901_p11 }
  0x1d   :  { %p904_p0 = pnand %p903_p13, %p897_p10 }
  0x1f   :  { %907 = shalt.err (!%p904_p0)
}
  0x20   :  { %47 = dma.hbm_to_vmem [thread:$0]  %s1289_s2, 2048, %s42_s28, [#allocation6], %s914_s20, %s914_s20, %s915_s21  }
  0x21   :  { %908 = dma.done.wait [#allocation4], 1024  }
  0x22   :  { %909 = vsyncadd [#allocation4], 4294966272 }
  0x23   :  { %910 = dma.done.wait [#allocation6], 3072  }
  0x24   :  { %911 = vsyncadd [#allocation6], 4294964224  ;;  %v917_v0 = vmov 0.0   ;;  %vm918_vm0 = vmmov 0   ;;  %v90_v1 = vld [vmem:[#allocation7 + $0x78] sm:$0xff]  ;;  %v89_v2 = vld [vmem:[#allocation7 + $0x70] sm:$0xff] }
  0x25   :  { %725 = vmatprep.subr.mxu0 %v917_v0  ;;  %757 = vmatprep.mubr.msk.f32.mxu0 %vm918_vm0, %v917_v0  ;;  %v88_v3 = vld [vmem:[#allocation7 + $0x68] sm:$0xff]  ;;  %v87_v4 = vld [vmem:[#allocation7 + $0x60] sm:$0xff]  ;;  %v86_v5 = vld [vmem:[#allocation7 + $0x58] sm:$0xff]  ;;  %vm152_vm1 = vcmask 1041409   ;;  %vm154_vm2 = vcmask 1042434   ;;  %vm156_vm3 = vcmask 1043459  }
  0x26   :  { %726 = vmatpush3.msra.mxu0 %v90_v1  ;;  %v958_v6 = vld [vmem:[#allocation3] sm:$0xff]  ;;  %v960_v7 = vld [vmem:[#allocation3 + $0x8] sm:$0xff]  ;;  %v963_v8 = vld [vmem:[#allocation3 + $0x10] sm:$0xff]  ;;  %vm486_vm14 = vcmask 130112  }
  0x27   :  { %727 = vmatprep.subr.mxu0 %v917_v0  ;;  %v965_v9 = vld [vmem:[#allocation3 + $0x18] sm:$0xff]  ;;  %v967_v10 = vld [vmem:[#allocation3 + $0x20] sm:$0xff]  ;;  %v92_v11 = vadd.f32 %v960_v7, %v958_v6  ;;  %v971_v12 = vld [vmem:[#allocation3 + $0x28] sm:$0xff] }
  0x28   :  { %728 = vmatpush3.msra.mxu0 %v89_v2  ;;  %v973_v13 = vld [vmem:[#allocation3 + $0x30] sm:$0xff]  ;;  %v975_v14 = vld [vmem:[#allocation3 + $0x38] sm:$0xff]  ;;  %v99_v15 = vadd.f32 %v965_v9, %v963_v8  ;;  %v106_v18 = vadd.f32 %v971_v12, %v967_v10  ;;  %v84_v21 = vld [vmem:[#allocation7 + $0x48] sm:$0xff] }
  0x29   :  { %729 = vmatprep.subr.mxu0 %v917_v0  ;;  %v85_v16 = vld [vmem:[#allocation7 + $0x50] sm:$0xff]  ;;  %v93_v17 = vrot.slane %v92_v11, 4  ;;  %v113_v19 = vadd.f32 %v975_v14, %v973_v13  ;;  %v83_v26 = vld [vmem:[#allocation7 + $0x40] sm:$0xff]  ;;  %v82_v31 = vld [vmem:[#allocation7 + $0x38] sm:$0xff] }
  0x2a   :  { %730 = vmatpush3.msra.mxu0 %v88_v3  ;;  %v100_v20 = vrot.slane %v99_v15, 4  ;;  %v107_v23 = vrot.slane %v106_v18, 4  ;;  %v81_v36 = vld [vmem:[#allocation7 + $0x30] sm:$0xff]  ;;  %v80_v41 = vld [vmem:[#allocation7 + $0x28] sm:$0xff]  ;;  %v79_v46 = vld [vmem:[#allocation7 + $0x20] sm:$0xff] }
  0x2b   :  { %731 = vmatprep.subr.mxu0 %v917_v0  ;;  %v94_v22 = vadd.f32 %v93_v17, %v92_v11  ;;  %v114_v24 = vrot.slane %v113_v19, 4  ;;  %v78_v51 = vld [vmem:[#allocation7 + $0x18] sm:$0xff]  ;;  %v77_v56 = vld [vmem:[#allocation7 + $0x10] sm:$0xff]  ;;  %v76_v59 = vld [vmem:[#allocation7 + $0x8] sm:$0xff] }
  0x2c   :  { %732 = vmatpush3.msra.mxu0 %v87_v4  ;;  %v101_v25 = vadd.f32 %v100_v20, %v99_v15  ;;  %v108_v28 = vadd.f32 %v107_v23, %v106_v18  ;;  %v75_v60 = vld [vmem:[#allocation7] sm:$0xff]  ;;  %v233_v20 = vlaneseq }
  0x2d   :  { %733 = vmatprep.subr.mxu0 %v917_v0  ;;  %v95_v27 = vrot.slane %v94_v22, 2  ;;  %v115_v29 = vadd.f32 %v114_v24, %v113_v19 }
  0x2e   :  { %734 = vmatpush3.msra.mxu0 %v86_v5  ;;  %v102_v30 = vrot.slane %v101_v25, 2  ;;  %v109_v33 = vrot.slane %v108_v28, 2 }
  0x2f   :  { %735 = vmatprep.subr.mxu0 %v917_v0  ;;  %v96_v32 = vadd.f32 %v95_v27, %v94_v22  ;;  %v116_v34 = vrot.slane %v115_v29, 2  ;;  %v476_v22 = vand.u32 127, %v233_v20 }
  0x30   :  { %736 = vmatpush3.msra.mxu0 %v85_v16  ;;  %v103_v35 = vadd.f32 %v102_v30, %v101_v25  ;;  %v110_v38 = vadd.f32 %v109_v33, %v108_v28 }
  0x31   :  { %737 = vmatprep.subr.mxu0 %v917_v0  ;;  %v97_v37 = vrot.slane %v96_v32, 1  ;;  %v117_v39 = vadd.f32 %v116_v34, %v115_v29  ;;  %v481_v24 = vadd.s32 4294967288, %v476_v22 }
  0x32   :  { %738 = vmatpush3.msra.mxu0 %v84_v21  ;;  %v104_v40 = vrot.slane %v103_v35, 1  ;;  %v111_v43 = vrot.slane %v110_v38, 1  ;;  %v234_v21 = vshrl.u32 %v233_v20, 7 }
  0x33   :  { %739 = vmatprep.subr.mxu0 %v917_v0  ;;  %v98_v42 = vadd.f32 %v97_v37, %v96_v32  ;;  %v118_v44 = vrot.slane %v117_v39, 1 }
  0x34   :  { %740 = vmatpush3.msra.mxu0 %v83_v26  ;;  %v105_v45 = vadd.f32 %v104_v40, %v103_v35  ;;  %v112_v47 = vadd.f32 %v111_v43, %v110_v38  ;;  %v998_v23 = vsub.s32 %v476_v22, %v234_v21  ;;  %v1000_v25 = vsub.s32 %v481_v24, %v234_v21 }
  0x35   :  { %741 = vmatprep.subr.mxu0 %v917_v0  ;;  %v119_v48 = vadd.f32 %v118_v44, %v117_v39  ;;  %v704_v49 = vmul.f32 -0.0625, %v98_v42  ;;  %v919_v26 = vmov 1966171168   ;;  %v256_v32 = vsub.s32 0, %v234_v21 }
  0x36   :  { %742 = vmatpush3.msra.mxu0 %v82_v31  ;;  %v705_v50 = vmul.f32 -0.0625, %v105_v45  ;;  %v706_v52 = vmul.f32 -0.0625, %v112_v47  ;;  %v231_v27 = vunpack.c.l.s4 %v919_v26  ;;  %v67_v45 = vld [vmem:[#allocation5] sm:$0xff] }
  0x37   :  { %743 = vmatprep.subr.mxu0 %v917_v0  ;;  %v707_v53 = vmul.f32 -0.0625, %v119_v48  ;;  %v128_v54 = vmul.f32 1.442695, %v704_v49 }
  0x38   :  { %744 = vmatpush3.msra.mxu0 %v81_v36  ;;  %v130_v55 = vmul.f32 1.442695, %v705_v50  ;;  %v132_v57 = vmul.f32 1.442695, %v706_v52  ;;  %v232_v28 = vunpack.c.0.s8 %v231_v27  ;;  %v68_v36 = vld [vmem:[#allocation5 + $0x8] sm:$0xff]  ;;  %v70_v50 = vld [vmem:[#allocation5 + $0x18] sm:$0xff] }
  0x39   :  { %745 = vmatprep.subr.mxu0 %v917_v0  ;;  %768 = vpow2.f32 %v128_v54  ;;  %v134_v58 = vmul.f32 1.442695, %v707_v53  ;;  %v72_v53 = vld [vmem:[#allocation5 + $0x28] sm:$0xff]  ;;  %v71_v54 = vld [vmem:[#allocation5 + $0x20] sm:$0xff] }
  0x3a   :  { %746 = vmatpush3.msra.mxu0 %v80_v41  ;;  %770 = vpow2.f32 %v130_v55  ;;  %v235_v29 = vsub.s32 %v232_v28, %v234_v21 }
  0x3b   :  { %747 = vmatprep.subr.mxu0 %v917_v0  ;;  %772 = vpow2.f32 %v132_v57  ;;  %v74_v57 = vld [vmem:[#allocation5 + $0x38] sm:$0xff] }
  0x3c   :  { %748 = vmatpush3.msra.mxu0 %v79_v46  ;;  %774 = vpow2.f32 %v134_v58  ;;  %v73_v58 = vld [vmem:[#allocation5 + $0x30] sm:$0xff] }
  0x3d   :  { %749 = vmatprep.subr.mxu0 %v917_v0 }
  0x3e   :  { %750 = vmatpush3.msra.mxu0 %v78_v51  ;;  %v69_v51 = vld [vmem:[#allocation5 + $0x10] sm:$0xff] }
  0x3f   :  { %751 = vmatprep.subr.mxu0 %v917_v0 }
  0x40   :  { %752 = vmatpush3.msra.mxu0 %v77_v56 }
  0x41   :  { %753 = vmatprep.subr.mxu0 %v917_v0 }
  0x42   :  { %754 = vmatpush3.msra.mxu0 %v76_v59 }
  0x43   :  { %755 = vmatprep.subr.mxu0 %v917_v0 }
  0x44   :  { %756 = vmatpush3.msra.mxu0 %v75_v60 }
  0x46   :  { %v769_v61 = vpop.eup %768 }
  0x47   :  { %v771_v62 = vpop.eup %770  ;;  %v136_v63 = vadd.f32 1.0, %v769_v61  ;;  %v1013_v61 = vstv %s1290_s3 }
  0x48   :  { %v773_v1 = vpop.eup %772  ;;  %v137_v2 = vadd.f32 1.0, %v771_v62 }
  0x49   :  { %v775_v3 = vpop.eup %774  ;;  %v138_v4 = vadd.f32 1.0, %v773_v1  ;;  %776 = vrcp.f32 %v136_v63 }
  0x4a   :  { %v139_v5 = vadd.f32 1.0, %v775_v3  ;;  %778 = vrcp.f32 %v137_v2 }
  0x4b   :  { %780 = vrcp.f32 %v138_v4 }
  0x4c   :  { %782 = vrcp.f32 %v139_v5 }
  0x56   :  { %v777_v11 = vpop.eup %776 }
  0x57   :  { %v779_v15 = vpop.eup %778 }
  0x58   :  { %v781_v16 = vpop.eup %780  ;;  %v153_v0 = vsel %vm152_vm1, %v779_v15, %v777_v11 }
  0x59   :  { %v783_v17 = vpop.eup %782  ;;  %v155_v18 = vsel %vm154_vm2, %v781_v16, %v153_v0 }
  0x5a   :  { %v157_v19 = vsel %vm156_vm3, %v783_v17, %v155_v18 }
  0x5b   :  { %758 = vmatmul.mubr.f32.vlgmr.msra.gmra.mxu0 %v157_v19 }
 0x11b   :  { %v225_v30 = vpop.f32.mrf.mxu0 }
 0x11c   :  { %v236_v31 = vrot.slane %v225_v30, %v235_v29 }
 0x11d   :  { %v759_v33 = vpop.f32.mrf.mxu0 }
 0x11e   :  { %v237_v34 = vcombine.high %v236_v31, %v236_v31  ;;  %v244_v35 = vrot.slane %v236_v31, %v235_v29 }
 0x120   :  { %v251_v37 = vrot.slane %v237_v34, %v235_v29  ;;  %v257_v38 = vrot.slane %v244_v35, %v256_v32  ;;  %v252_v42 = vcombine.high %v244_v35, %v244_v35 }
 0x122   :  { %v261_v39 = vrot.slane %v251_v37, %v256_v32  ;;  %v308_v40 = vmul.f32 %v257_v38, %v68_v36  ;;  %v274_v41 = vmul.f32 %v257_v38, %v958_v6  ;;  %v275_v44 = vmul.f32 %v257_v38, %v960_v7 }
 0x123   :  { %v265_v46 = vrot.slane %v252_v42, %v256_v32  ;;  %v307_v48 = vmul.f32 %v257_v38, %v67_v45 }
 0x124   :  { %317 = vadd.xlane.f32.xlu1 %v308_v40  ;;  %282 = vadd.xlane.f32.xlu0 %v274_v41  ;;  %v276_v43 = vmul.f32 %v261_v39, %v963_v8  ;;  %v277_v47 = vmul.f32 %v261_v39, %v965_v9  ;;  %v253_v8 = vcombine.high %v251_v37, %v251_v37 }
 0x125   :  { %v279_v49 = vmul.f32 %v265_v46, %v971_v12  ;;  %v278_v6 = vmul.f32 %v265_v46, %v967_v10  ;;  %v310_v52 = vmul.f32 %v261_v39, %v70_v50  ;;  %v309_v7 = vmul.f32 %v261_v39, %v69_v51 }
 0x126   :  { %v269_v55 = vrot.slane %v253_v8, %v256_v32  ;;  %v312_v9 = vmul.f32 %v265_v46, %v72_v53  ;;  %v311_v56 = vmul.f32 %v265_v46, %v71_v54 }
 0x128   :  { %286 = vadd.xlane.f32.xlu1 %v276_v43  ;;  %284 = vadd.xlane.f32.xlu0 %v275_v44  ;;  %v281_v12 = vmul.f32 %v269_v55, %v975_v14  ;;  %v280_v10 = vmul.f32 %v269_v55, %v973_v13  ;;  %v314_v59 = vmul.f32 %v269_v55, %v74_v57 }
 0x129   :  { %v313_v60 = vmul.f32 %v269_v55, %v73_v58 }
 0x12c   :  { %288 = vadd.xlane.f32.xlu1 %v277_v47  ;;  %315 = vadd.xlane.f32.xlu0 %v307_v48 }
 0x130   :  { %292 = vadd.xlane.f32.xlu1 %v279_v49  ;;  %290 = vadd.xlane.f32.xlu0 %v278_v6 }
 0x134   :  { %321 = vadd.xlane.f32.xlu1 %v310_v52  ;;  %319 = vadd.xlane.f32.xlu0 %v309_v7 }
 0x138   :  { %325 = vadd.xlane.f32.xlu1 %v312_v9  ;;  %323 = vadd.xlane.f32.xlu0 %v311_v56 }
 0x13c   :  { %296 = vadd.xlane.f32.xlu1 %v281_v12  ;;  %294 = vadd.xlane.f32.xlu0 %v280_v10 }
 0x140   :  { %329 = vadd.xlane.f32.xlu1 %v314_v59  ;;  %327 = vadd.xlane.f32.xlu0 %v313_v60 }
 0x1ad   :  { %v318_v62 = vpop.xlane.xlu1 %317  ;;  %v283_v14 = vpop.xlane.xlu0 %282 }
 0x1ae   :  { %v1016_v63 = vadd.f32 %v318_v62, %v1013_v61  ;;  %v1019_v13 = vadd.f32 %v1013_v61, %v283_v14 }
 0x1b0   :  { %v532_v1 = vand.u32 2147483647, %v1016_v63  ;;  %v339_v2 = vsub.f32 0.0, %v1019_v13 }
 0x1b1   :  { %v287_v3 = vpop.xlane.xlu1 %286  ;;  %v285_v5 = vpop.xlane.xlu0 %284 }
 0x1b2   :  { %v540_v4 = vsub.f32 0.0, %v532_v1  ;;  %v1024_v11 = vadd.f32 %v1013_v61, %v287_v3  ;;  %v355_v15 = vand.u32 2147483647, %v339_v2  ;;  %v1029_v16 = vadd.f32 %v1013_v61, %v285_v5 }
 0x1b3   :  { %v524_v5 = vmax.f32 %v1016_v63, 0.0 }
 0x1b4   :  { %v549_v0 = vmul.f32 1.442695, %v540_v4  ;;  %v341_v17 = vsub.f32 0.0, %v1024_v11  ;;  %v363_v18 = vsub.f32 0.0, %v355_v15  ;;  %v340_v19 = vsub.f32 0.0, %v1029_v16 }
 0x1b5   :  { %v289_v20 = vpop.xlane.xlu1 %288  ;;  %v316_v22 = vpop.xlane.xlu0 %315  ;;  %v1075_v15 = vmax.f32 %v339_v2, 0.0 }
 0x1b6   :  { %784 = vpow2.f32 %v549_v0  ;;  %v357_v21 = vand.u32 2147483647, %v341_v17  ;;  %v1036_v24 = vadd.f32 %v1013_v61, %v289_v20  ;;  %v371_v26 = vmul.f32 1.442695, %v363_v18 }
 0x1b7   :  { %v356_v27 = vand.u32 2147483647, %v340_v19  ;;  %v1041_v28 = vadd.f32 %v316_v22, %v1013_v61  ;;  %v1079_v20 = vmax.f32 %v340_v19, 0.0 }
 0x1b8   :  { %v365_v29 = vsub.f32 0.0, %v357_v21  ;;  %v342_v30 = vsub.f32 0.0, %v1036_v24  ;;  %786 = vpow2.f32 %v371_v26  ;;  %v1083_v21 = vmax.f32 %v341_v17, 0.0 }
 0x1b9   :  { %v364_v31 = vsub.f32 0.0, %v356_v27  ;;  %v531_v32 = vand.u32 2147483647, %v1041_v28  ;;  %v293_v33 = vpop.xlane.xlu1 %292  ;;  %v291_v36 = vpop.xlane.xlu0 %290  ;;  %v523_v26 = vmax.f32 %v1041_v28, 0.0 }
 0x1ba   :  { %v375_v34 = vmul.f32 1.442695, %v365_v29  ;;  %v358_v35 = vand.u32 2147483647, %v342_v30  ;;  %v304_v37 = vadd.f32 %v1013_v61, %v293_v33  ;;  %v1049_v40 = vadd.f32 %v1013_v61, %v291_v36 }
 0x1bb   :  { %v373_v38 = vmul.f32 1.442695, %v364_v31  ;;  %v539_v39 = vsub.f32 0.0, %v531_v32  ;;  %v1090_v29 = vmax.f32 %v342_v30, 0.0 }
 0x1bc   :  { %788 = vpow2.f32 %v375_v34  ;;  %v366_v41 = vsub.f32 0.0, %v358_v35  ;;  %v344_v42 = vsub.f32 0.0, %v304_v37  ;;  %v343_v44 = vsub.f32 0.0, %v1049_v40 }
 0x1bd   :  { %790 = vpow2.f32 %v373_v38  ;;  %v547_v43 = vmul.f32 1.442695, %v539_v39  ;;  %v322_v45 = vpop.xlane.xlu1 %321  ;;  %v320_v48 = vpop.xlane.xlu0 %319 }
 0x1be   :  { %v377_v46 = vmul.f32 1.442695, %v366_v41  ;;  %v360_v47 = vand.u32 2147483647, %v344_v42  ;;  %v1053_v49 = vadd.f32 %v322_v45, %v1013_v61  ;;  %v359_v6 = vand.u32 2147483647, %v343_v44 }
 0x1bf   :  { %792 = vpow2.f32 %v547_v43  ;;  %v1056_v50 = vadd.f32 %v320_v48, %v1013_v61  ;;  %v1095_v11 = vmax.f32 %v344_v42, 0.0  ;;  %v1103_v35 = vmax.f32 %v343_v44, 0.0 }
 0x1c0   :  { %794 = vpow2.f32 %v377_v46  ;;  %v368_v51 = vsub.f32 0.0, %v360_v47  ;;  %v534_v8 = vand.u32 2147483647, %v1053_v49  ;;  %v367_v52 = vsub.f32 0.0, %v359_v6 }
 0x1c1   :  { %v533_v7 = vand.u32 2147483647, %v1056_v50  ;;  %v324_v55 = vpop.xlane.xlu0 %323  ;;  %v326_v60 = vpop.xlane.xlu1 %325  ;;  %v526_v36 = vmax.f32 %v1053_v49, 0.0  ;;  %v525_v39 = vmax.f32 %v1056_v50, 0.0 }
 0x1c2   :  { %v381_v53 = vmul.f32 1.442695, %v368_v51  ;;  %v542_v54 = vsub.f32 0.0, %v534_v8  ;;  %v379_v56 = vmul.f32 1.442695, %v367_v52  ;;  %v1063_v10 = vadd.f32 %v324_v55, %v1013_v61 }
 0x1c3   :  { %v1060_v9 = vpop.eup %784  ;;  %v541_v12 = vsub.f32 0.0, %v533_v7  ;;  %v1068_v3 = vadd.f32 %v326_v60, %v1013_v61 }
 0x1c4   :  { %v572_v57 = vadd.f32 1.0, %v1060_v9  ;;  %796 = vpow2.f32 %v381_v53  ;;  %v553_v59 = vmul.f32 1.442695, %v542_v54  ;;  %v535_v14 = vand.u32 2147483647, %v1063_v10 }
 0x1c5   :  { %798 = vpow2.f32 %v379_v56  ;;  %v551_v58 = vmul.f32 1.442695, %v541_v12  ;;  %v787_v62 = vpop.eup %786  ;;  %v575_v27 = vmul.f32 -0.5, %v1060_v9  ;;  %v578_v16 = vand.u32 2147483647, %v1060_v9  ;;  %v297_v60 = vpop.xlane.xlu1 %296 }
 0x1c6   :  { %800 = vlog2.f32 %v572_v57  ;;  %v387_v1 = vadd.f32 1.0, %v787_v62  ;;  %v543_v0 = vsub.f32 0.0, %v535_v14  ;;  %v390_v13 = vmul.f32 -0.5, %v787_v62 }
 0x1c7   :  { %802 = vpow2.f32 %v551_v58  ;;  %v536_v17 = vand.u32 2147483647, %v1068_v3  ;;  %v576_v37 = vadd.f32 1.0, %v575_v27  ;;  %vm1107_vm4 = vcmp.lt.f32.partialorder %v578_v16, 0.0004427343 }
 0x1c8   :  { %804 = vpow2.f32 %v553_v59  ;;  %v555_v34 = vmul.f32 1.442695, %v543_v0  ;;  %v391_v38 = vadd.f32 1.0, %v390_v13  ;;  %v393_v41 = vand.u32 2147483647, %v787_v62 }
 0x1c9   :  { %v1070_v4 = vpop.eup %788  ;;  %806 = vlog2.f32 %v387_v1  ;;  %v544_v42 = vsub.f32 0.0, %v536_v17  ;;  %v577_v7 = vmul.f32 %v1060_v9, %v576_v37 }
 0x1ca   :  { %v791_v18 = vpop.eup %790  ;;  %v405_v22 = vadd.f32 1.0, %v1070_v4  ;;  %v408_v32 = vmul.f32 -0.5, %v1070_v4  ;;  %v411_v44 = vand.u32 2147483647, %v1070_v4  ;;  %v1115_v53 = vmul.f32 %v787_v62, %v391_v38 }
 0x1cb   :  { %v396_v2 = vadd.f32 1.0, %v791_v18  ;;  %v399_v24 = vmul.f32 -0.5, %v791_v18  ;;  %v402_v45 = vand.u32 2147483647, %v791_v18  ;;  %vm1120_vm5 = vcmp.lt.f32.partialorder %v393_v41, 0.0004427343 }
 0x1cc   :  { %v1092_v31 = vpop.eup %792  ;;  %808 = vlog2.f32 %v405_v22  ;;  %v409_v46 = vadd.f32 1.0, %v408_v32  ;;  %v557_v59 = vmul.f32 1.442695, %v544_v42  ;;  %vm1137_vm7 = vcmp.lt.f32.partialorder %v411_v44, 0.0004427343 }
 0x1cd   :  { %v1098_v19 = vpop.eup %794  ;;  %810 = vlog2.f32 %v396_v2  ;;  %v563_v33 = vadd.f32 1.0, %v1092_v31  ;;  %v400_v48 = vadd.f32 1.0, %v399_v24  ;;  %v566_v6 = vmul.f32 -0.5, %v1092_v31 }
 0x1ce   :  { %v414_v30 = vadd.f32 1.0, %v1098_v19  ;;  %v417_v51 = vmul.f32 -0.5, %v1098_v19  ;;  %v420_v54 = vand.u32 2147483647, %v1098_v19  ;;  %v569_v57 = vand.u32 2147483647, %v1092_v31 }
 0x1cf   :  { %812 = vlog2.f32 %v563_v33  ;;  %v1128_v22 = vmul.f32 %v791_v18, %v400_v48  ;;  %vm1130_vm6 = vcmp.lt.f32.partialorder %v402_v45, 0.0004427343  ;;  %v1135_v13 = vmul.f32 %v1070_v4, %v409_v46 }
 0x1d0   :  { %814 = vlog2.f32 %v414_v30  ;;  %v567_v16 = vadd.f32 1.0, %v566_v6  ;;  %v418_v17 = vadd.f32 1.0, %v417_v51  ;;  %vm1141_vm8 = vcmp.lt.f32.partialorder %v420_v54, 0.0004427343  ;;  %v295_v54 = vpop.xlane.xlu0 %294 }
 0x1d1   :  { %v797_v43 = vpop.eup %796  ;;  %816 = vpow2.f32 %v555_v34  ;;  %v1146_v18 = vadd.f32 %v1013_v61, %v297_v60  ;;  %vm1148_vm9 = vcmp.lt.f32.partialorder %v569_v57, 0.0004427343 }
 0x1d2   :  { %v799_v47 = vpop.eup %798  ;;  %v432_v8 = vadd.f32 1.0, %v797_v43  ;;  %v435_v58 = vmul.f32 -0.5, %v797_v43  ;;  %v438_v33 = vand.u32 2147483647, %v797_v43  ;;  %v568_v44 = vmul.f32 %v1092_v31, %v567_v16 }
 0x1d3   :  { %v801_v52 = vpop.eup %800  ;;  %v423_v55 = vadd.f32 1.0, %v799_v47  ;;  %v426_v62 = vmul.f32 -0.5, %v799_v47  ;;  %v429_v4 = vand.u32 2147483647, %v799_v47  ;;  %v419_v48 = vmul.f32 %v1098_v19, %v418_v17  ;;  %v330_v17 = vpop.xlane.xlu1 %329 }
 0x1d4   :  { %v1118_v56 = vpop.eup %802  ;;  %818 = vlog2.f32 %v432_v8  ;;  %v574_v9 = vmul.f32 0.6931472, %v801_v52  ;;  %v436_v24 = vadd.f32 1.0, %v435_v58  ;;  %vm1159_vm10 = vcmp.lt.f32.partialorder %v438_v33, 0.0004427343 }
 0x1d5   :  { %v1125_v14 = vpop.eup %804  ;;  %820 = vlog2.f32 %v423_v55  ;;  %v581_v1 = vadd.f32 1.0, %v1118_v56  ;;  %v584_v30 = vmul.f32 -0.5, %v1118_v56  ;;  %v427_v45 = vadd.f32 1.0, %v426_v62 }
 0x1d6   :  { %v807_v0 = vpop.eup %806  ;;  %v590_v37 = vadd.f32 1.0, %v1125_v14  ;;  %v580_v41 = vsel %vm1107_vm4, %v577_v7, %v574_v9  ;;  %v587_v6 = vand.u32 2147483647, %v1118_v56  ;;  %v593_v40 = vmul.f32 -0.5, %v1125_v14 }
 0x1d7   :  { %822 = vlog2.f32 %v581_v1  ;;  %v389_v42 = vmul.f32 0.6931472, %v807_v0  ;;  %v346_v7 = vsub.f32 0.0, %v1146_v18  ;;  %v1167_v31 = vadd.f32 %v580_v41, %v524_v5 }
 0x1d8   :  { %824 = vpow2.f32 %v557_v59  ;;  %vm1169_vm11 = vcmp.lt.f32.partialorder %v429_v4, 0.0004427343  ;;  %v437_v57 = vmul.f32 %v797_v43, %v436_v24  ;;  %v585_v58 = vadd.f32 1.0, %v584_v30 }
 0x1d9   :  { %v809_v38 = vpop.eup %808  ;;  %826 = vlog2.f32 %v590_v37  ;;  %v395_v60 = vsel %vm1120_vm5, %v1115_v53, %v389_v42  ;;  %v428_v62 = vmul.f32 %v799_v47, %v427_v45  ;;  %v596_v1 = vand.u32 2147483647, %v1125_v14 }
 0x1da   :  { %v811_v46 = vpop.eup %810  ;;  %v407_v8 = vmul.f32 0.6931472, %v809_v38  ;;  %vm1179_vm12 = vcmp.lt.f32.partialorder %v587_v6, 0.0004427343  ;;  %v362_v43 = vand.u32 2147483647, %v346_v7  ;;  %v1186_v16 = vadd.f32 %v1013_v61, %v295_v54 }
 0x1db   :  { %v398_v51 = vmul.f32 0.6931472, %v811_v46  ;;  %v594_v12 = vadd.f32 1.0, %v593_v40  ;;  %v658_v4 = vrot.slane %v1167_v31, %v1000_v25  ;;  %v459_v24 = vadd.f32 %v395_v60, %v1075_v15 }
 0x1dc   :  { %v813_v55 = vpop.eup %812  ;;  %v413_v53 = vsel %vm1137_vm7, %v1135_v13, %v407_v8  ;;  %v586_v37 = vmul.f32 %v1118_v56, %v585_v58  ;;  %vm1203_vm13 = vcmp.lt.f32.partialorder %v596_v1, 0.0004427343  ;;  %v370_v13 = vsub.f32 0.0, %v362_v43  ;;  %v328_v8 = vpop.xlane.xlu0 %327 }
 0x1dd   :  { %v815_v59 = vpop.eup %814  ;;  %v565_v9 = vmul.f32 0.6931472, %v813_v55  ;;  %v404_v47 = vsel %vm1130_vm6, %v1128_v22, %v398_v51  ;;  %v1208_v2 = vadd.f32 %v330_v17, %v1013_v61  ;;  %v461_v41 = vadd.f32 %v413_v53, %v1083_v21 }
 0x1de   :  { %v1177_v0 = vpop.eup %816  ;;  %v416_v63 = vmul.f32 0.6931472, %v815_v59  ;;  %v460_v32 = vadd.f32 %v404_v47, %v1079_v20  ;;  %v345_v42 = vsub.f32 0.0, %v1186_v16  ;;  %v595_v46 = vmul.f32 %v1125_v14, %v594_v12 }
 0x1df   :  { %v599_v33 = vadd.f32 1.0, %v1177_v0  ;;  %v571_v22 = vsel %vm1148_vm9, %v568_v44, %v565_v9  ;;  %v385_v44 = vmul.f32 1.442695, %v370_v13  ;;  %v602_v20 = vmul.f32 -0.5, %v1177_v0 }
 0x1e0   :  { %v422_v30 = vsel %vm1141_vm8, %v419_v48, %v416_v63  ;;  %v635_v6 = vadd.f32 %v571_v22, %v523_v26  ;;  %v361_v21 = vand.u32 2147483647, %v345_v42  ;;  %v485_v28 = vrot.slane %v460_v32, %v1000_v25 }
 0x1e1   :  { %v819_v38 = vpop.eup %818  ;;  %828 = vlog2.f32 %v599_v33  ;;  %v462_v34 = vadd.f32 %v422_v30, %v1090_v29  ;;  %v538_v55 = vand.u32 2147483647, %v1208_v2  ;;  %v1232_v60 = vadd.f32 %v328_v8, %v1013_v61 }
 0x1e2   :  { %v821_v15 = vpop.eup %820  ;;  %v434_v56 = vmul.f32 0.6931472, %v819_v38  ;;  %830 = vpow2.f32 %v385_v44  ;;  %v369_v52 = vsub.f32 0.0, %v361_v21  ;;  %v654_v1 = vrot.slane %v635_v6, %v998_v23 }
 0x1e3   :  { %v425_v45 = vmul.f32 0.6931472, %v821_v15  ;;  %v495_v58 = vrot.slane %v462_v34, %v1000_v25  ;;  %v546_v43 = vsub.f32 0.0, %v538_v55  ;;  %v480_v5 = vrot.slane %v459_v24, %v998_v23 }
 0x1e4   :  { %v823_v48 = vpop.eup %822  ;;  %v440_v51 = vsel %vm1159_vm10, %v437_v57, %v434_v56  ;;  %v383_v63 = vmul.f32 1.442695, %v369_v52  ;;  %v491_v17 = vrot.slane %v461_v41, %v998_v23  ;;  %v603_v47 = vadd.f32 1.0, %v602_v20 }
 0x1e5   :  { %v431_v29 = vsel %vm1169_vm11, %v428_v62, %v425_v45  ;;  %v464_v40 = vadd.f32 %v440_v51, %v1095_v11  ;;  %v583_v14 = vmul.f32 0.6931472, %v823_v48  ;;  %v825_v54 = vpop.eup %824  ;;  %v537_v12 = vand.u32 2147483647, %v1232_v60 }
 0x1e6   :  { %v463_v26 = vadd.f32 %v431_v29, %v1103_v35  ;;  %v827_v57 = vpop.eup %826  ;;  %v608_v19 = vadd.f32 1.0, %v825_v54  ;;  %v487_v33 = vsel %vm486_vm14, %v485_v28, %v480_v5  ;;  %v496_v30 = vsel %vm486_vm14, %v495_v58, %v491_v17 }
 0x1e7   :  { %v589_v59 = vsel %vm1179_vm12, %v586_v37, %v583_v14  ;;  %v504_v9 = vrot.slane %v464_v40, %v1000_v25  ;;  %v592_v62 = vmul.f32 0.6931472, %v827_v57  ;;  %v515_v38 = vsel %vm152_vm1, %v496_v30, %v487_v33 }
 0x1e8   :  { %v500_v11 = vrot.slane %v463_v26, %v998_v23  ;;  %v637_v35 = vadd.f32 %v589_v59, %v525_v39  ;;  %832 = vlog2.f32 %v608_v19  ;;  %v561_v39 = vmul.f32 1.442695, %v546_v43 }
 0x1e9   :  { %v598_v61 = vsel %vm1203_vm13, %v595_v46, %v592_v62  ;;  %834 = vpow2.f32 %v383_v63  ;;  %v659_v49 = vsel %vm486_vm14, %v658_v4, %v654_v1  ;;  %v605_v22 = vand.u32 2147483647, %v1177_v0 }
 0x1ea   :  { %v663_v53 = vrot.slane %v637_v35, %v998_v23  ;;  %v638_v50 = vadd.f32 %v598_v61, %v526_v36  ;;  %v505_v24 = vsel %vm486_vm14, %v504_v9, %v500_v11  ;;  %836 = vpow2.f32 %v561_v39 }
 0x1eb   :  { %v545_v27 = vsub.f32 0.0, %v537_v12  ;;  %v1258_v13 = vsel %vm154_vm2, %v505_v24, %v515_v38  ;;  %v611_v32 = vmul.f32 -0.5, %v825_v54  ;;  %v604_v45 = vmul.f32 %v1177_v0, %v603_v47 }
 0x1ec   :  { %v667_v37 = vrot.slane %v638_v50, %v1000_v25  ;;  %vm606_vm15 = vcmp.lt.f32.partialorder %v605_v22, 0.0004427343  ;;  %v527_v48 = vmax.f32 %v1063_v10, 0.0  ;;  %v614_v6 = vand.u32 2147483647, %v825_v54 }
 0x1ed   :  { %v559_v56 = vmul.f32 1.442695, %v545_v27  ;;  %v612_v4 = vadd.f32 1.0, %v611_v32  ;;  %v528_v40 = vmax.f32 %v1068_v3, 0.0  ;;  %v354_v17 = vmax.f32 %v346_v7, 0.0 }
 0x1ee   :  { %v829_v36 = vpop.eup %828  ;;  %v668_v41 = vsel %vm486_vm14, %v667_v37, %v663_v53  ;;  %vm615_vm0 = vcmp.lt.f32.partialorder %v614_v6, 0.0004427343  ;;  %v353_v37 = vmax.f32 %v345_v42, 0.0  ;;  %v530_v27 = vmax.f32 %v1208_v2, 0.0 }
 0x1ef   :  { %v601_v15 = vmul.f32 0.6931472, %v829_v36  ;;  %v687_v34 = vsel %vm152_vm1, %v668_v41, %v659_v49  ;;  %v831_v46 = vpop.eup %830  ;;  %838 = vpow2.f32 %v559_v56  ;;  %v613_v8 = vmul.f32 %v825_v54, %v612_v4 }
 0x1f0   :  { %v450_v44 = vadd.f32 1.0, %v831_v46  ;;  %v453_v55 = vmul.f32 -0.5, %v831_v46  ;;  %v456_v3 = vand.u32 2147483647, %v831_v46  ;;  %vm519_vm5 = vcmask 125952  }
 0x1f1   :  { %v607_v31 = vsel %vm606_vm15, %v604_v45, %v601_v15  ;;  %vm696_vm7 = vcmask 3072  }
 0x1f2   :  { %840 = vlog2.f32 %v450_v44  ;;  %v639_v20 = vadd.f32 %v607_v31, %v527_v48  ;;  %v454_v54 = vadd.f32 1.0, %v453_v55  ;;  %vm457_vm1 = vcmp.lt.f32.partialorder %v456_v3, 0.0004427343 }
 0x1f4   :  { %v672_v26 = vrot.slane %v639_v20, %v998_v23  ;;  %v455_v1 = vmul.f32 %v831_v46, %v454_v54  ;;  %v529_v46 = vmax.f32 %v1232_v60, 0.0 }
 0x1f5   :  { %v833_v51 = vpop.eup %832 }
 0x1f6   :  { %v610_v21 = vmul.f32 0.6931472, %v833_v51  ;;  %v835_v29 = vpop.eup %834 }
 0x1f7   :  { %v441_v0 = vadd.f32 1.0, %v835_v29  ;;  %v837_v28 = vpop.eup %836  ;;  %v444_v9 = vmul.f32 -0.5, %v835_v29  ;;  %v447_v61 = vand.u32 2147483647, %v835_v29 }
 0x1f8   :  { %v616_v14 = vsel %vm615_vm0, %v613_v8, %v610_v21  ;;  %v626_v57 = vadd.f32 1.0, %v837_v28  ;;  %v629_v63 = vmul.f32 -0.5, %v837_v28  ;;  %v632_v39 = vand.u32 2147483647, %v837_v28 }
 0x1f9   :  { %v640_v52 = vadd.f32 %v616_v14, %v528_v40  ;;  %842 = vlog2.f32 %v441_v0  ;;  %v445_v5 = vadd.f32 1.0, %v444_v9 }
 0x1fa   :  { %844 = vlog2.f32 %v626_v57  ;;  %v630_v47 = vadd.f32 1.0, %v629_v63  ;;  %vm633_vm4 = vcmp.lt.f32.partialorder %v632_v39, 0.0004427343 }
 0x1fb   :  { %v676_v10 = vrot.slane %v640_v52, %v1000_v25  ;;  %v446_v30 = vmul.f32 %v835_v29, %v445_v5 }
 0x1fc   :  { %v839_v59 = vpop.eup %838  ;;  %v631_v36 = vmul.f32 %v837_v28, %v630_v47 }
 0x1fd   :  { %v677_v58 = vsel %vm486_vm14, %v676_v10, %v672_v26  ;;  %v617_v11 = vadd.f32 1.0, %v839_v59  ;;  %v620_v12 = vmul.f32 -0.5, %v839_v59  ;;  %v623_v32 = vand.u32 2147483647, %v839_v59 }
 0x1fe   :  { %v688_v19 = vsel %vm154_vm2, %v677_v58, %v687_v34  ;;  %vm448_vm2 = vcmp.lt.f32.partialorder %v447_v61, 0.0004427343 }
 0x1ff   :  { %v841_v35 = vpop.eup %840  ;;  %846 = vlog2.f32 %v617_v11  ;;  %v621_v7 = vadd.f32 1.0, %v620_v12  ;;  %vm624_vm6 = vcmp.lt.f32.partialorder %v623_v32, 0.0004427343 }
 0x200   :  { %v452_v62 = vmul.f32 0.6931472, %v841_v35 }
 0x201   :  { %v622_v42 = vmul.f32 %v839_v59, %v621_v7 }
 0x202   :  { %v458_v43 = vsel %vm457_vm1, %v455_v1, %v452_v62 }
 0x203   :  { %v466_v50 = vadd.f32 %v458_v43, %v354_v17 }
 0x205   :  { %v513_v22 = vrot.slane %v466_v50, %v1000_v25 }
 0x206   :  { %v843_v53 = vpop.eup %842 }
 0x207   :  { %v443_v33 = vmul.f32 0.6931472, %v843_v53  ;;  %v845_v24 = vpop.eup %844 }
 0x208   :  { %v628_v49 = vmul.f32 0.6931472, %v845_v24 }
 0x209   :  { %v449_v38 = vsel %vm448_vm2, %v446_v30, %v443_v33 }
 0x20a   :  { %v465_v18 = vadd.f32 %v449_v38, %v353_v37  ;;  %v634_v15 = vsel %vm633_vm4, %v631_v36, %v628_v49 }
 0x20b   :  { %v642_v34 = vadd.f32 %v634_v15, %v530_v27 }
 0x20c   :  { %v509_v41 = vrot.slane %v465_v18, %v998_v23  ;;  %v847_v56 = vpop.eup %846 }
 0x20d   :  { %v619_v16 = vmul.f32 0.6931472, %v847_v56  ;;  %v685_v2 = vrot.slane %v642_v34, %v1000_v25 }
 0x20e   :  { %v514_v45 = vsel %vm486_vm14, %v513_v22, %v509_v41 }
 0x20f   :  { %v517_v31 = vsel %vm156_vm3, %v514_v45, %v1258_v13  ;;  %v625_v4 = vsel %vm624_vm6, %v622_v42, %v619_v16 }
 0x210   :  { %v520_v44 = vsel %vm519_vm5, %v517_v31, 0.0  ;;  %v641_v48 = vadd.f32 %v625_v4, %v529_v46 }
 0x211   :  { %521 = vadd.xlane.f32.xlu0 %v520_v44 }
 0x212   :  { %v681_v6 = vrot.slane %v641_v48, %v998_v23 }
 0x214   :  { %v686_v51 = vsel %vm486_vm14, %v685_v2, %v681_v6 }
 0x215   :  { %v689_v20 = vsel %vm156_vm3, %v686_v51, %v688_v19 }
 0x216   :  { %v691_v21 = vsel %vm519_vm5, %v689_v20, 0.0 }
 0x217   :  { %692 = vadd.xlane.f32.xlu1 %v691_v21 }
 0x29a   :  { %v522_v8 = vpop.xlane.xlu0 %521 }
 0x2a0   :  { %v693_v60 = vpop.xlane.xlu1 %692 }
 0x2a1   :  { %v694_v29 = vadd.f32 %v693_v60, %v522_v8 }
 0x2a3   :  { %v695_v40 = vmul.f32 0.03125, %v694_v29 }
 0x2a5   :  { %697 = vst.msk [vmem:[%s1291_s4] sm:$0xf] %vm696_vm7, %v695_v40 }
 0x2a6   :  { %702 = vsyncpa [#allocation4], 1 }
 0x2a7   :  { %703 = vsyncpa [#allocation6], 1 }

</bundles_post_ra>
